<compile_context>
chip_gen: v5e
topology: v5e:2x2
jax: 0.10.0
libtpu: 0.0.40
codegen_flags: <defaults>
</compile_context>

<pallas_src>
import numpy as np

import jax
import jax.numpy as jnp
from jax import lax
from jax.experimental import pallas as pl
from jax.experimental.pallas import tpu as pltpu


# ----------------------------------------------------------------------------
# kernel 1: fused L2-normalize + Gram similarity      (batched over 2 inputs)
#   xn = x / max(||x||, 1e-12)      gram = (xn xn^T + 1) * 0.5
# ----------------------------------------------------------------------------
def _norm_gram_kernel(x_ref, xn_ref, g_ref):
    x = x_ref[...].astype(jnp.float32)                         # (N, D)
    # torch does x / torch.norm(x); clamp like F.normalize (eps=1e-12) to avoid 0/0
    inv = lax.rsqrt(jnp.maximum(jnp.sum(x * x, axis=-1, keepdims=True), 1e-24))
    xn = x * inv
    xn_ref[...] = xn
    # Gram via contraction on dim 1 of both operands -> MXU, no explicit x.T
    g = lax.dot_general(xn, xn, (((1,), (1,)), ((), ())),
                        preferred_element_type=jnp.float32)
    g_ref[...] = (g + 1.0) * 0.5


def normalize_and_gram(emb, t1):
    """Batched over the (embeddings, t1_features) pair; t1 is zero-padded to the
    common feature dim (zero columns change neither norms nor the Gram)."""
    n, d_emb = emb.shape
    d_t1 = t1.shape[1]
    d = max(d_emb, d_t1)
    x = jnp.stack([jnp.pad(emb.astype(jnp.float32), ((0, 0), (0, d - d_emb))),
                   jnp.pad(t1.astype(jnp.float32), ((0, 0), (0, d - d_t1)))])
    xn, gram = pl.pallas_call(
        _norm_gram_kernel,
        out_shape=(jax.ShapeDtypeStruct((2, n, d), jnp.float32),
                   jax.ShapeDtypeStruct((2, n, n), jnp.float32)),
        grid=(2,),
        in_specs=[pl.BlockSpec((None, n, d), lambda b: (b, 0, 0))],
        out_specs=(pl.BlockSpec((None, n, d), lambda b: (b, 0, 0)),
                   pl.BlockSpec((None, n, n), lambda b: (b, 0, 0))),
        compiler_params=pltpu.CompilerParams(dimension_semantics=("parallel",)),
    )(x)
    return xn[0, :, :d_emb], xn[1, :, :d_t1], gram[0], gram[1]


# ----------------------------------------------------------------------------
# kernel 2: PAE edge network, tiled over edges (lane-dense output)
#   standardize -> Linear -> ReLU -> BatchNorm1d(eval) -> Dropout(eval=id)
#   -> Linear -> CosineSimilarity -> (cos + 1) * 0.5
# ----------------------------------------------------------------------------
def _pae_kernel(xt_ref, mu_ref, isd_ref, w1_ref, b1_ref, w2_ref, b2_ref,
                gamma_ref, beta_ref, mean_ref, var_ref, p_ref):
    tm = p_ref.shape[-1]                                       # edges in this tile

    # fold eval-mode BatchNorm1d into a scale/shift (EUP rsqrt)
    bn_scale = gamma_ref[...] * lax.rsqrt(var_ref[...] + 1e-5)          # (H, 1)
    bn_shift = beta_ref[...] - mean_ref[...] * bn_scale

    def parser_front(e):                                       # endpoint e in {0, 1}
        v = (xt_ref[e].astype(jnp.float32) - mu_ref[e]) * isd_ref[e]    # (F, TM)
        h = jnp.dot(w1_ref[...], v, preferred_element_type=jnp.float32) + b1_ref[...]
        h = jnp.maximum(h, 0.0)                                # ReLU
        return h * bn_scale + bn_shift                         # BN(eval); Dropout(eval)=id

    # Fuse the big (H,H) matmul: both endpoints stacked along the lane axis.
    h = jnp.concatenate([parser_front(0), parser_front(1)], axis=1)      # (H, 2*TM)
    h = jnp.dot(w2_ref[...], h.astype(jnp.bfloat16),           # bf16 MXU operands
                preferred_element_type=jnp.float32) + b2_ref[...]        # (H, 2*TM)

    h1, h2 = h[:, :tm], h[:, tm:]
    eps2 = 1e-8 * 1e-8                                         # CosineSimilarity eps=1e-8
    inv1 = lax.rsqrt(jnp.maximum(jnp.sum(h1 * h1, axis=0, keepdims=True), eps2))
    inv2 = lax.rsqrt(jnp.maximum(jnp.sum(h2 * h2, axis=0, keepdims=True), eps2))
    cos = jnp.sum(h1 * h2, axis=0, keepdims=True) * inv1 * inv2          # (1, TM)
    p_ref[...] = (cos + 1.0) * 0.5                             # lane-dense store


def pae_forward(edge_input, w1, b1, w2, b2, gamma, beta, mean, var, *, block_m=512):
    """edge_input: (M, 2F).  Weights in PyTorch Linear layout: w1 (H, F), w2 (H, H)."""
    m, two_f = edge_input.shape
    f_dim = two_f // 2

    x32 = edge_input.astype(jnp.float32)
    # Column standardization over ALL edges (reference applies numpy mean/std
    # (ddof=0) before PAE); hoisted here so edge tiles stay independent.
    mu = jnp.mean(x32, axis=0)
    inv_sd = 1.0 / (jnp.std(x32, axis=0) + 1e-6)

    tm = int(min(block_m, pl.cdiv(m, 128) * 128))              # lane tile, mult. of 128
    m_pad = int(pl.cdiv(m, tm)) * tm
    # (2, F, Mpad): endpoint-major, features on sublanes, edges on lanes.
    xt = jnp.pad(x32.T.reshape(2, f_dim, m), ((0, 0), (0, 0), (0, m_pad - m)))

    col = lambda v: jnp.asarray(v, jnp.float32).reshape(-1, 1)
    args = (xt, mu.reshape(2, f_dim, 1), inv_sd.reshape(2, f_dim, 1),
            jnp.asarray(w1, jnp.float32), col(b1),
            jnp.asarray(w2, jnp.bfloat16), col(b2),            # bf16 halves weight traffic
            col(gamma), col(beta), col(mean), col(var))

    def full_spec(a):                                          # resident full-array block
        return pl.BlockSpec(a.shape, lambda *_: (0,) * a.ndim)

    in_specs = [pl.BlockSpec((2, f_dim, tm), lambda i: (0, 0, i))]
    in_specs += [full_spec(a) for a in args[1:]]

    p = pl.pallas_call(
        _pae_kernel,
        out_shape=jax.ShapeDtypeStruct((1, m_pad), jnp.float32),
        grid=(m_pad // tm,),
        in_specs=in_specs,
        out_specs=pl.BlockSpec((1, tm), lambda i: (0, i)),
        compiler_params=pltpu.CompilerParams(
            dimension_semantics=("parallel",),                 # shard edge tiles across v7x TCs
            vmem_limit_bytes=32 * 1024 * 1024),                # sized for v7x's smaller VMEM
    )(*args)
    return p[0, :m]


# ----------------------------------------------------------------------------
# kernel 3: prepare_adj, batched over the 3 adjacency matrices
#   A_sym = max(A, A.T);  B = I + A_sym;  out = D^-1 B
# ----------------------------------------------------------------------------
def _prepare_adj_kernel(a_ref, o_ref):
    a = a_ref[...].astype(jnp.float32)                         # (N, N)
    a_sym = jnp.maximum(a, a.T)        # == a + a.T*(a.T>a) - a*(a.T>a)
    n = a_sym.shape[0]
    eye = (lax.broadcasted_iota(jnp.int32, (n, n), 0)
           == lax.broadcasted_iota(jnp.int32, (n, n), 1)).astype(jnp.float32)
    b = a_sym + eye
    # TODO(synk): normalize_torch source unavailable; row normalization D^-1 (I + A)
    # (standard GCN convention) is used here.
    rowsum = jnp.sum(b, axis=-1, keepdims=True)
    r_inv = jnp.where(rowsum > 0.0, pl.reciprocal(rowsum, approx=True), 0.0)
    o_ref[...] = b * r_inv


def prepare_adj_batched(adjs):
    bsz, n, _ = adjs.shape
    return pl.pallas_call(
        _prepare_adj_kernel,
        out_shape=jax.ShapeDtypeStruct((bsz, n, n), jnp.float32),
        grid=(bsz,),
        in_specs=[pl.BlockSpec((None, n, n), lambda i: (i, 0, 0))],
        out_specs=pl.BlockSpec((None, n, n), lambda i: (i, 0, 0)),
        compiler_params=pltpu.CompilerParams(dimension_semantics=("parallel",)),
    )(adjs)


# ----------------------------------------------------------------------------
# LGMF_GNN forward (graph-construction portion, eval mode)
# ----------------------------------------------------------------------------
def lgmf_gnn_forward(embeddings, t1_features, edge_index, edge_input,
                     pae_params, k_num):
    # TODO(synk): FBNETGEN local_gnn (dataloader loop, CE losses, np.save side
    # effects) is not provided; `embeddings` / `t1_features` stand in for its outputs.
    emb_n, t1_n, fadj1, fadj2 = normalize_and_gram(embeddings, t1_features)

    # PAE edge network over all candidate edges (eval: no edge dropout).
    edge_weight = pae_forward(edge_input, *pae_params)         # (M,)

    n_nodes = embeddings.shape[0]
    # sadj scatter (plain-JAX glue — data-dependent indexing)
    sadj = jnp.zeros((n_nodes, n_nodes), jnp.float32)
    sadj = sadj.at[edge_index[0], edge_index[1]].set(edge_weight)
    sadj = sadj.at[edge_index[1], edge_index[0]].set(edge_weight)

    # top-k KNN sparsification (plain-JAX glue — data-dependent scatter)
    def knn_binarize(fadj):
        _, idx = lax.top_k(fadj, k_num)
        rows = jnp.arange(n_nodes)[:, None]
        return jnp.zeros((n_nodes, n_nodes), jnp.float32).at[rows, idx].set(1.0)

    prepped = prepare_adj_batched(
        jnp.stack([sadj, knn_binarize(fadj1), knn_binarize(fadj2)]))
    sadj, fadj1, fadj2 = prepped[0], prepped[1], prepped[2]

    # TODO(synk): MAMFGCN global_gnn is not provided; node_logits/att/emb1/com1..3
    # cannot be computed — return the prepared graph inputs it would consume.
    return emb_n, t1_n, edge_weight, sadj, fadj1, fadj2, k_num


# ----------------------------------------------------------------------------
if __name__ == "__main__":
    key = jax.random.PRNGKey(0)
    k_emb, k_t1, k_non, k_w1, k_w2 = jax.random.split(key, 5)

    N = 16        # number of subjects (graph nodes)
    D_EMB = 32    # local-GNN embedding size
    D_T1 = 16     # t1 reduced feature size
    NONIMG = 4    # non-imaging feature dim -> PAE input_dim = 2*NONIMG//2 = NONIMG
    HIDDEN = 128  # PAE hidden width (per module definition)
    K_NUM = 8     # deterministic `n` (original: np.random.choice(range(8, 12)))

    embeddings = jax.random.normal(k_emb, (N, D_EMB), jnp.float32)
    t1_features = jax.random.normal(k_t1, (N, D_T1), jnp.float32)
    nonimg = jax.random.normal(k_non, (N, NONIMG), jnp.float32)

    # PAE parameters in PyTorch Linear layout (out_features, in_features):
    # kaiming_normal_ (fan_in) weights, zero biases, BatchNorm1d default eval stats.
    w1 = jax.random.normal(k_w1, (HIDDEN, NONIMG), jnp.float32) * jnp.sqrt(2.0 / NONIMG)
    b1 = jnp.zeros((HIDDEN,), jnp.float32)
    w2 = jax.random.normal(k_w2, (HIDDEN, HIDDEN), jnp.float32) * jnp.sqrt(2.0 / HIDDEN)
    b2 = jnp.zeros((HIDDEN,), jnp.float32)
    gamma = jnp.ones((HIDDEN,), jnp.float32)
    beta = jnp.zeros((HIDDEN,), jnp.float32)
    run_mean = jnp.zeros((HIDDEN,), jnp.float32)
    run_var = jnp.ones((HIDDEN,), jnp.float32)
    pae_params = (w1, b1, w2, b2, gamma, beta, run_mean, run_var)

    # dl.get_PAE_inputs glue: all (i<j) node pairs, concat their nonimg features.
    iu, ju = np.triu_indices(N, k=1)
    edge_index = jnp.asarray(np.stack([iu, ju]), jnp.int32)          # (2, M)
    edge_input = jnp.concatenate([nonimg[iu], nonimg[ju]], axis=1)   # (M, 2*NONIMG)

    outs = lgmf_gnn_forward(embeddings, t1_features, edge_index, edge_input,
                            pae_params, K_NUM)
    for o in outs[:-1]:
        jax.block_until_ready(o)

    emb_n, t1_n, edge_weight, sadj, fadj1, fadj2, k_num = outs
    assert emb_n.shape == (N, D_EMB) and t1_n.shape == (N, D_T1)
    assert edge_weight.shape == (edge_index.shape[1],)
    assert sadj.shape == fadj1.shape == fadj2.shape == (N, N)
    assert bool(jnp.all(jnp.isfinite(edge_weight)))
    assert bool(jnp.all(jnp.isfinite(sadj))) and bool(jnp.all(jnp.isfinite(fadj1)))
    assert bool(jnp.all(jnp.isfinite(fadj2)))
    print("KERNEL_OK")
</pallas_src>

<mosaic_0001>
module attributes {stable_mosaic.version = 11 : i64} {
  func.func @_norm_gram_kernel(%arg0: i32, %arg1: memref<1x16x32xf32, #tpu.memory_space<vmem>>, %arg2: memref<1x16x32xf32, #tpu.memory_space<vmem>>, %arg3: memref<1x16x16xf32, #tpu.memory_space<vmem>>) attributes {dimension_semantics = [#tpu.dimension_semantics<parallel>], iteration_bounds = array<i64: 2>, scalar_prefetch = 0 : i64, scratch_operands = 0 : i64, tpu.core_type = #tpu.core_type<tc>, window_params = [{transform_indices = @transform_0, window_bounds = array<i64: 1, 16, 32>}, {transform_indices = @transform_1, window_bounds = array<i64: 1, 16, 32>}, {transform_indices = @transform_2, window_bounds = array<i64: 1, 16, 16>}]} {
    %c0 = arith.constant 0 : index
    %c0_0 = arith.constant 0 : index
    %c0_1 = arith.constant 0 : index
    %0 = vector.load %arg1[%c0, %c0_0, %c0_1] : memref<1x16x32xf32, #tpu.memory_space<vmem>>, vector<1x16x32xf32>
    %1 = vector.shape_cast %0 : vector<1x16x32xf32> to vector<16x32xf32>
    %2 = arith.mulf %1, %1 : vector<16x32xf32>
    %cst = arith.constant dense<0.000000e+00> : vector<16xf32>
    %3 = vector.multi_reduction <add>, %2, %cst [1] : vector<16x32xf32> to vector<16xf32>
    %4 = vector.shape_cast %3 : vector<16xf32> to vector<16x1xf32>
    %cst_2 = arith.constant 1.000000e-24 : f32
    %5 = vector.broadcast %cst_2 : f32 to vector<16x1xf32>
    %6 = arith.maximumf %4, %5 : vector<16x1xf32>
    %7 = math.rsqrt %6 : vector<16x1xf32>
    %8 = vector.broadcast %7 : vector<16x1xf32> to vector<16x32xf32>
    %9 = arith.mulf %1, %8 : vector<16x32xf32>
    %c0_3 = arith.constant 0 : index
    %c0_4 = arith.constant 0 : index
    %c0_5 = arith.constant 0 : index
    %10 = vector.load %arg2[%c0_3, %c0_4, %c0_5] : memref<1x16x32xf32, #tpu.memory_space<vmem>>, vector<1x16x32xf32>
    %11 = vector.shape_cast %10 : vector<1x16x32xf32> to vector<16x32xf32>
    %12 = vector.shape_cast %9 : vector<16x32xf32> to vector<1x16x32xf32>
    tpu.vector_store %arg2[%c0_3, %c0_4, %c0_5], %12 {strides = array<i32>} : memref<1x16x32xf32, #tpu.memory_space<vmem>>, vector<1x16x32xf32>,
    %cst_6 = arith.constant dense<0.000000e+00> : vector<16x16xf32>
    %13 = tpu.matmul %9, %9, %cst_6 {dimension_numbers = #tpu.dot_dimension_numbers<[1], [1], [0], [0], [0, 0, 1, 0], [], []>} : vector<16x32xf32>, vector<16x32xf32>, vector<16x16xf32> -> vector<16x16xf32>
    %cst_7 = arith.constant 1.000000e+00 : f32
    %14 = vector.broadcast %cst_7 : f32 to vector<16x16xf32>
    %15 = arith.addf %13, %14 : vector<16x16xf32>
    %cst_8 = arith.constant 5.000000e-01 : f32
    %16 = vector.broadcast %cst_8 : f32 to vector<16x16xf32>
    %17 = arith.mulf %15, %16 : vector<16x16xf32>
    %c0_9 = arith.constant 0 : index
    %c0_10 = arith.constant 0 : index
    %c0_11 = arith.constant 0 : index
    %18 = vector.load %arg3[%c0_9, %c0_10, %c0_11] : memref<1x16x16xf32, #tpu.memory_space<vmem>>, vector<1x16x16xf32>
    %19 = vector.shape_cast %18 : vector<1x16x16xf32> to vector<16x16xf32>
    %20 = vector.shape_cast %17 : vector<16x16xf32> to vector<1x16x16xf32>
    tpu.vector_store %arg3[%c0_9, %c0_10, %c0_11], %20 {strides = array<i32>} : memref<1x16x16xf32, #tpu.memory_space<vmem>>, vector<1x16x16xf32>,
    return
  }
  func.func @transform_0(%arg0: i32) -> (i32, i32, i32) {
    %c0_i32 = arith.constant 0 : i32
    %c0_i32_0 = arith.constant 0 : i32
    %c0_i32_1 = arith.constant 0 : i32
    return %arg0, %c0_i32, %c0_i32_0 : i32, i32, i32
  }
  func.func @transform_1(%arg0: i32) -> (i32, i32, i32) {
    %c0_i32 = arith.constant 0 : i32
    %c0_i32_0 = arith.constant 0 : i32
    %c0_i32_1 = arith.constant 0 : i32
    return %arg0, %c0_i32, %c0_i32_0 : i32, i32, i32
  }
  func.func @transform_2(%arg0: i32) -> (i32, i32, i32) {
    %c0_i32 = arith.constant 0 : i32
    %c0_i32_0 = arith.constant 0 : i32
    %c0_i32_1 = arith.constant 0 : i32
    return %arg0, %c0_i32, %c0_i32_0 : i32, i32, i32
  }
}

</mosaic_0001>

<bundles_post_ra>
// kernel: tpu_custom_call.1
= control target key start
LH: loop header
LB: loop body
LE: loop exit
PB: predicated region body
PF: predicated region fallthrough
CT: control target
= control target key end

     0   :  { %8 = vsyncpa [#allocation3], 0  ;;  %s787_s0 = inlined_call_operand.hbm [shape: f32[2,16,32], index: 0, kind: input, shape index: {}]   ;;  %s788_s1 = inlined_call_operand.hbm [shape: f32[2,16,32], index: 1, kind: output, shape index: {0}]   ;;  %s789_s2 = inlined_call_operand.hbm [shape: f32[2,16,16], index: 2, kind: output, shape index: {1}]  }
   0x1   :  { %10 = vsyncpa [#allocation3 + $0x1], 0 }
   0x2   :  { %11 = vsyncpa [#allocation4], 0 }
   0x3   :  { %13 = vsyncpa [#allocation4 + $0x1], 0 }
   0x4   :  { %14 = vsyncpa [#allocation7], 0 }
   0x5   :  { %16 = vsyncpa [#allocation7 + $0x1], 0  ;;  %s625_s9 = smov 0   ;;  %s627_s10 = smov 0  }
   0x6   :  { %s629_s11 = smov 0   ;;  %s631_s12 = smov 0  }
   0x7 LB: > { %s646_s13 = sadd.s32 4294967295, %s604_s12   ;;  %s390_s14 = sadd.s32 4294967294, %s604_s12   ;;  %s604_s12 = sphi %s631_s12, %s799_s12   ;;  %s600_s11 = sphi %s629_s11, %s798_s11   ;;  %s596_s10 = sphi %s627_s10, %s797_s10   ;;  %s592_s9 = sphi %s625_s9, %s796_s9  }
   0x8   : > { %s650_s15 = sadd.s32 1, %s604_s12   ;;  %s29_s16 = sadd.s32 1, %s600_s11 }
   0x9   : > { %s26_s17 = ssub.s32 %s604_s12, %s650_s15  ;;  %p36_p0 = scmp.ne.s32.totalorder %s600_s11, %s596_s10 }
   0xa   : > { %p27_p1 = scmp.eq.s32.totalorder %s26_s17, 0  ;;  %p37_p2 = scmp.eq.s32.totalorder %s604_s12, 0 }
   0xb   : > { %p42_p3 = scmp.ne.s32.totalorder %s596_s10, %s592_s9  ;;  %p43_p4 = scmp.eq.s32.totalorder %s646_s13, 0 }
   0xc   : > { %s662_s18 = scalar_select %p27_p1, %s600_s11, %s29_s16  }
   0xd   : > { %p664_p5 = por %p37_p2, %p36_p0  ;;  %p668_p6 = por %p43_p4, %p42_p3 }
   0xe   : > { %p66_p7 = scmp.eq.s32.totalorder %s646_s13, 1  ;;  %p72_p8 = scmp.eq.s32.totalorder %s390_s14, 1 }
   0xf   : > { %p434_p10 = scmp.lt.s32.totalorder %s604_s12, 2  ;;  %s118_s23 = sand.u32 1, %s600_s11  }
  0x10   : > { %p675_p11 = por %p66_p7, %p36_p0  ;;  %p679_p12 = por %p72_p8, %p42_p3 }
  0x11   : > { %s412_s24 = sshll.u32 %s604_s12, 4  ;;  %s393_s25 = sshll.u32 %s118_s23, 4 }
  0x12   : > { %s127_s28 = scalar_lea.hbm %s787_s0, %s412_s24  ;;  %s122_s30 = scalar_lea.vmem [#allocation2], %s393_s25 }
  0x13   : > { %s128_s29 = sshll.u32 %s127_s28, 4  ;;  %s130_s3 = sshll.u32 %s122_s30, 4  ;;  %s129_s29 = int_to_ptr.hbm [resolvable:$true] %s128_s29  ;;  %s131_s3 = int_to_ptr.vmem [resolvable:$true] %s130_s3 }
  0x14   : > { %p690_p13 = pnand %p434_p10, %p664_p5  ;;  %p396_p0 = scmp.ge.s32.totalorder %s604_s12, 1 }
  0x15   : > { %p138_p1 = scmp.lt.s32.totalorder %s604_s12, 3  ;;  %s119_s5 = scalar_lea.sflag [#allocation3], %s118_s23 }
  0x16   : > { %s476_s6 = sshra.s32 %s129_s29, 4  ;;  %p480_p3 = pneg %p690_p13  ;;  %s477_s6 = int_to_ptr.hbm [resolvable:$true] %s476_s6 }
  0x17   : > { %s478_s7 = scalar_lea.hbm %s477_s6, 16  ;;  %s483_s16 = scalar_lea.hbm %s787_s0, 32 }
  0x18   : > { %p479_p2 = scmp.ne.s32.totalorder %s477_s6, %s478_s7  ;;  %p484_p5 = scmp.lt.s32.totalorder %s477_s6, %s787_s0 }
  0x19   : > { %p485_p8 = scmp.lt.s32.totalorder %s483_s16, %s478_s7 }
  0x1a   : > { %p481_p4 = pnand %p480_p3, %p479_p2 }
  0x1b   : > { %p486_p10 = por %p485_p8, %p484_p5 }
  0x1c   : > { %p482_p7 = pneg %p481_p4 }
  0x1e   : > { %p487_p9 = pnand %p486_p10, %p482_p7 }
  0x20   : > { %490 = shalt.err (!%p487_p9)
}
  0x21   : > { %s606_s23 = smov 128   ;;  %s607_s24 = smov 8  }
  0x22   : > { %426 = dma.hbm_to_vmem [thread:$0]  (!%p690_p13), %s129_s29, 256, %s131_s3, %s119_s5, %s606_s23, %s606_s23, %s607_s24  }
  0x23   : > { %p139_p2 = pnand %p396_p0, %p138_p1 }
  0x24   : > { %s711_s25 = sand.u32 (!%p139_p2), 1, %s596_s10  }
  0x25   : > { %142 = sbr.rel (%p139_p2) target bundleno = 330 (0x14a), region = 24  ;;  %s714_s26 = sshll.u32 (!%p139_p2), %s711_s25, 4 }
  0x26   : > { %s145_s27 = scalar_lea.sflag (!%p139_p2), [#allocation3], %s711_s25  ;;  %s148_s28 = scalar_lea.vmem (!%p139_p2), [#allocation2], %s714_s26 }
  0x2a   : > { %579 = dma.done.wait (%p668_p6), %s145_s27, 256  }
  0x2b   : > { %581 = vsyncadd (%p668_p6), %s145_s27, 4294967040  ;;  %v176_v0 = vld [vmem:[%s148_s28 + $0x8] sm:$0xff]  ;;  %vm179_vm0 = vcmask 261120   ;;  %v175_v2 = vld [vmem:[%s148_s28] sm:$0xff]  ;;  %s167_s20 = scalar_lea.vmem [#allocation5], %s714_s26  ;;  %s413_s29 = sshll.u32 %s646_s13, 4 }
  0x2c   : > { %v178_v1 = vmul.f32 %v176_v0, %v176_v0  ;;  %v177_v4 = vmul.f32 %v175_v2, %v175_v2  ;;  %s263_s4 = scalar_lea.hbm %s788_s1, %s413_s29  ;;  %s264_s5 = sshll.u32 %s167_s20, 4  ;;  %s265_s5 = int_to_ptr.vmem [resolvable:$true] %s264_s5 }
  0x2d   : > { %s266_s6 = sshll.u32 %s263_s4, 4  ;;  %s247_s7 = scalar_lea.sflag [#allocation4], %s711_s25  ;;  %s267_s6 = int_to_ptr.hbm [resolvable:$true] %s266_s6 }
  0x2e   : > { %v183_v3 = vsel %vm179_vm0, %v178_v1, 0.0  ;;  %v180_v5 = vsel %vm179_vm0, %v177_v4, 0.0  ;;  %s520_s8 = sshra.s32 %s267_s6, 4  ;;  %s526_s13 = scalar_lea.hbm %s788_s1, 32  ;;  %s521_s8 = int_to_ptr.hbm [resolvable:$true] %s520_s8 }
  0x2f   : > { %184 = vadd.xlane.f32.xlu0 %v183_v3  ;;  %s522_s14 = scalar_lea.hbm %s521_s8, 16  ;;  %p527_p0 = scmp.lt.s32.totalorder %s521_s8, %s788_s1 }
  0x30   : > { %p523_p6 = scmp.ne.s32.totalorder %s521_s8, %s522_s14  ;;  %p528_p1 = scmp.lt.s32.totalorder %s526_s13, %s522_s14 }
  0x32   : > { %p524_p9 = pnand %p523_p6, %p675_p11  ;;  %p529_p3 = por %p528_p1, %p527_p0 }
  0x34   : > { %p525_p13 = pneg %p524_p9 }
  0x36   : > { %p530_p4 = pnand %p529_p3, %p525_p13 }
  0x37   : > { %181 = vadd.xlane.f32.xlu0 %v180_v5 }
  0xa2   : > { %v185_v6 = vpop.xlane.xlu0 %184 }
  0xa3   : > { %v187_v7 = vmax.f32 %v185_v6, 1e-24 }
  0xa5   : > { %472 = vrsqrt.f32 %v187_v7  ;;  %vm204_vm2 = vweird.f32 %v187_v7 }
  0xaa   : > { %v182_v8 = vpop.xlane.xlu0 %181 }
  0xab   : > { %v473_v9 = vpop.eup %472  ;;  %v186_v10 = vmax.f32 %v182_v8, 1e-24 }
  0xac   : > { %v199_v11 = vmul.f32 %v473_v9, %v187_v7  ;;  %vm205_vm1 = vweird.f32 %v473_v9 }
  0xad   : > { %474 = vrsqrt.f32 %v186_v10  ;;  %vm206_vm3 = vmor %vm204_vm2, %vm205_vm1  ;;  %vm194_vm5 = vweird.f32 %v186_v10 }
  0xae   : > { %v200_v12 = vmul.f32 %v473_v9, %v199_v11 }
  0xb0   : > { %v201_v13 = vmul.f32 0.5, %v200_v12 }
  0xb2   : > { %v202_v14 = vsub.f32 1.5, %v201_v13 }
  0xb3   : > { %v475_v15 = vpop.eup %474 }
  0xb4   : > { %v203_v16 = vmul.f32 %v473_v9, %v202_v14  ;;  %v189_v17 = vmul.f32 %v475_v15, %v186_v10  ;;  %vm195_vm4 = vweird.f32 %v475_v15 }
  0xb5   : > { %vm196_vm6 = vmor %vm194_vm5, %vm195_vm4 }
  0xb6   : > { %v207_v18 = vsel %vm206_vm3, %v473_v9, %v203_v16  ;;  %v190_v19 = vmul.f32 %v475_v15, %v189_v17 }
  0xb7   : > { %v209_v20 = vmul.f32 %v207_v18, %v176_v0 }
  0xb8   : > { %v191_v21 = vmul.f32 0.5, %v190_v19 }
  0xb9   : > { %400 = vmatpush.xpose.msk.msra.mxu0 %vm179_vm0, %v209_v20  ;;  %415 = vmatpush.xpose.msk.msra.mxu1 %vm179_vm0, %v209_v20  ;;  %211 = vst.msk [vmem:[%s167_s20 + $0x8] sm:$0xff] %vm179_vm0, %v209_v20 }
  0xba   : > { %v192_v22 = vsub.f32 1.5, %v191_v21 }
  0xbc   : > { %v193_v23 = vmul.f32 %v475_v15, %v192_v22 }
  0xbe   : > { %v197_v24 = vsel %vm196_vm6, %v475_v15, %v193_v23 }
  0xbf   : > { %v208_v25 = vmul.f32 %v197_v24, %v175_v2 }
  0xc1   : > { %401 = vmatpush.xpose.msk.msra.mxu0 %vm179_vm0, %v208_v25  ;;  %416 = vmatpush.xpose.msk.msra.mxu1 %vm179_vm0, %v208_v25  ;;  %210 = vst.msk [vmem:[%s167_s20] sm:$0xff] %vm179_vm0, %v208_v25 }
  0xc4   : > { %402 = vmatmul.msk.f32.vlgmr.msra.gmra.mxu0 %vm179_vm0, %v208_v25  ;;  %403 = vmatmul.msk.f32.vlgmr.msra.gmra.mxu1 %vm179_vm0, %v209_v20 }
  0xc5   : > { %533 = shalt.err (!%p530_p4)
}
  0xc6   : > { %s608_s24 = smov 128   ;;  %s609_s27 = smov 8   ;;  %vm243_vm7 = vcmask 130048  }
  0xc7   : > { %419 = dma.vmem_to_hbm [thread:$0]  (%p675_p11), %s265_s5, 256, %s267_s6, %s247_s7, %s608_s24, %s608_s24, %s609_s27  }
  0xc8   : > { %s280_s30 = scalar_lea.hbm %s789_s2, %s413_s29  ;;  %s174_s3 = scalar_lea.vmem [#allocation6], %s714_s26 }
  0xc9   : > { %s281_s4 = sshll.u32 %s174_s3, 4  ;;  %s283_s8 = sshll.u32 %s280_s30, 4  ;;  %s282_s4 = int_to_ptr.vmem [resolvable:$true] %s281_s4  ;;  %s284_s8 = int_to_ptr.hbm [resolvable:$true] %s283_s8 }
  0xca   : > { %s252_s5 = scalar_lea.sflag [#allocation7], %s711_s25  ;;  %s548_s6 = sshra.s32 %s284_s8, 4  ;;  %s549_s6 = int_to_ptr.hbm [resolvable:$true] %s548_s6 }
  0xcb   : > { %s550_s7 = scalar_lea.hbm %s549_s6, 16  ;;  %s554_s14 = scalar_lea.hbm %s789_s2, 32 }
  0xcc   : > { %p551_p7 = scmp.ne.s32.totalorder %s549_s6, %s550_s7  ;;  %p555_p10 = scmp.lt.s32.totalorder %s549_s6, %s789_s2 }
  0xcd   : > { %p556_p2 = scmp.lt.s32.totalorder %s554_s14, %s550_s7 }
  0xce   : > { %p552_p5 = pnand %p551_p7, %p675_p11 }
  0xcf   : > { %p557_p6 = por %p556_p2, %p555_p10 }
  0xd0   : > { %p553_p8 = pneg %p552_p5 }
  0xd2   : > { %p558_p9 = pnand %p557_p6, %p553_p8 }
 0x141   : > { %v235_v26 = vpop.f32.mrf.mxu0  ;;  %v238_v27 = vpop.f32.mrf.mxu1 }
 0x142   : > { %v236_v28 = vadd.f32 1.0, %v235_v26  ;;  %v239_v29 = vadd.f32 1.0, %v238_v27 }
 0x144   : > { %v241_v30 = vmul.f32 0.5, %v236_v28  ;;  %v242_v31 = vmul.f32 0.5, %v239_v29 }
 0x146   : > { %244 = vst.msk [vmem:[%s174_s3] sm:$0xff] %vm243_vm7, %v241_v30 }
 0x147   : > { %245 = vst.msk [vmem:[%s174_s3 + $0x8] sm:$0xff] %vm243_vm7, %v242_v31 }
 0x148   : > { %561 = shalt.err (!%p558_p9)
}
 0x149   : > { %420 = dma.vmem_to_hbm [thread:$0]  (%p675_p11), %s282_s4, 256, %s284_s8, %s252_s5, %s608_s24, %s608_s24, %s609_s27  }
 0x14a PF: > { %s298_s25 = sand.u32 1, %s592_s9   ;;  %p795_p13 = scmp.ge.s32.totalorder %s604_s12, 2 }
 0x14b   : > { %s299_s13 = scalar_lea.sflag [#allocation4], %s298_s25 }
 0x14c   : > { %p428_p0 = pnand %p795_p13, %p679_p12 }
 0x14e   : > { %p429_p1 = pneg %p428_p0 }
 0x150   : > { %583 = dma.done.wait (%p429_p1), %s299_s13, 256  }
 0x151   : > { %585 = vsyncadd (%p429_p1), %s299_s13, 4294967040  ;;  %s309_s19 = scalar_lea.sflag [#allocation7], %s298_s25 }
 0x152   : > { %587 = dma.done.wait (%p429_p1), %s309_s19, 256  }
 0x153   : > { %589 = vsyncadd (%p429_p1), %s309_s19, 4294967040  ;;  %p19_p11 = scmp.ge.s32.totalorder %s650_s15, 4   ;;  %s796_s9 = smov %s596_s10 }
 0x154   : > { %s797_s10 = smov %s600_s11  ;;  %s798_s11 = smov %s662_s18 }
 0x155   : > { %s799_s12 = smov %s650_s15  ;;  %21 = sbr.rel (!%p19_p11) target bundleno = 7 (0x7), region = 86 }
 0x15a   :  { %315 = vsyncpa [#allocation3], 1 }
 0x15b   :  { %317 = vsyncpa [#allocation3 + $0x1], 1 }
 0x15c   :  { %318 = vsyncpa [#allocation4], 1 }
 0x15d   :  { %320 = vsyncpa [#allocation4 + $0x1], 1 }
 0x15e   :  { %321 = vsyncpa [#allocation7], 1 }
 0x15f   :  { %323 = vsyncpa [#allocation7 + $0x1], 1 }

</bundles_post_ra>
